<compile_context>
chip_gen: v7x
topology: tpu7x:2x2x1
jax: 0.10.0
libtpu: 0.0.40
codegen_flags: <defaults>
</compile_context>

<pallas_src>
import functools

import jax
import jax.numpy as jnp
from jax import lax
from jax.experimental import pallas as pl
from jax.experimental.pallas import tpu as pltpu


# ----------------------------- Pallas kernel -----------------------------
def _temporal_block_kernel(x_ref, w1_ref, b1_ref, w2_ref, b2_ref, *rest,
                           identity_res, K, dilation, pad, TL, L):
    """Channels-last fused TemporalBlock for one (batch, length-tile) grid step.

    x_ref : (TL + 4*pad, C_in_p)   overlapping halo window of the (zero-padded) input
    w1_ref: (K*C_in_p,  C_out_p)   conv1 weight, BN1 folded, taps stacked on rows
    w2_ref: (K*C_out_p, C_out_p)   conv2 weight, BN2 folded
    b*_ref: (1, C_out_p)           folded biases (f32)
    out   : (TL, C_out_p)
    """
    if identity_res:
        (out_ref,) = rest
        wd_ref = bd_ref = None
    else:
        wd_ref, bd_ref, out_ref = rest

    t = pl.program_id(1)
    TLh = TL + 2 * pad                      # conv1 rows needed by conv2's halo

    xw = x_ref[...]                         # (TL + 4*pad, C_in_p)

    # ---- conv1 (+ folded BN1) as ONE MXU matmul over K fused taps ----
    xcat1 = jnp.concatenate(
        [xw[k * dilation:k * dilation + TLh, :] for k in range(K)], axis=1)
    h1 = jnp.dot(xcat1, w1_ref[...], preferred_element_type=jnp.float32)
    h1 = jnp.maximum(h1 + b1_ref[...], 0.0)                 # bias+BN folded, ReLU

    # conv2 sees conv1's output zero-padded at the *sequence* boundaries only:
    # zero any extended row whose global index falls outside [0, L).
    g = t * TL - pad + lax.broadcasted_iota(jnp.int32, (TLh, 1), 0)
    h1 = jnp.where((g >= 0) & (g < L), h1, 0.0)
    h1 = h1.astype(w2_ref.dtype)            # bf16 activations when compute dtype is bf16

    # ---- conv2 (+ folded BN2), again one fused-tap matmul ----
    xcat2 = jnp.concatenate(
        [h1[k * dilation:k * dilation + TL, :] for k in range(K)], axis=1)
    h2 = jnp.dot(xcat2, w2_ref[...], preferred_element_type=jnp.float32)
    h2 = jnp.maximum(h2 + b2_ref[...], 0.0)

    # ---- residual path (f32 epilogue; identity path skips the 1x1 matmul) ----
    xr = xw[2 * pad:2 * pad + TL, :]
    if identity_res:
        res = xr.astype(jnp.float32)
    else:
        res = jnp.dot(xr, wd_ref[...], preferred_element_type=jnp.float32) + bd_ref[...]

    out_ref[...] = (h2 + res).astype(out_ref.dtype)


# ----------------------------- host-side helpers -----------------------------
def _round_up(n, m):
    return -(-n // m) * m


def _const_spec(a):
    return pl.BlockSpec(a.shape, lambda b, t: (0, 0))


def _fold_conv_bn(w_kio, b, s, t):
    """BN(eval)(conv(x)) == conv'(x) with w' = w*s per out-channel, b' = b*s + t."""
    return w_kio * s[None, None, :], b * s + t


def _pad_weight(w_kio, cin_p, cout_p, dtype):
    K, cin, cout = w_kio.shape
    wp = jnp.zeros((K, cin_p, cout_p), jnp.float32).at[:, :cin, :cout].set(w_kio)
    return wp.reshape(K * cin_p, cout_p).astype(dtype)


def _pad_bias(b, cout_p):
    return jnp.zeros((1, cout_p), jnp.float32).at[0, :b.shape[0]].set(b)


def temporal_block_forward(x_ncw, params, *, kernel_size, stride, dilation,
                           tile_l=512, compute_dtype=jnp.float32):
    """x_ncw: (B, C_in, L) (PyTorch Conv1d layout). Returns (B, C_out, L)."""
    assert stride == 1, "TemporalBlock uses stride=1"
    B, C_in, L = x_ncw.shape
    K = kernel_size
    assert ((K - 1) * dilation) % 2 == 0, "'same' padding requires even (K-1)*dilation"
    pad = (K - 1) * dilation // 2
    C_out = params['w1'].shape[2]
    identity_res = 'wd' not in params          # downsample is None <=> C_in == C_out
    if identity_res:
        assert C_in == C_out
    out_dtype = x_ncw.dtype

    # lane-dense channel padding (128-wide lanes, MXU N-dim)
    Cin_p = _round_up(C_in, 128)
    Cout_p = _round_up(C_out, 128)

    # ---- fold BN (eval) into conv weights/bias; pad + reshape for fused-tap matmul ----
    # TODO(synk): training-mode BatchNorm batch stats and Dropout are not implemented
    # (inference semantics: dropout = identity, BN uses running statistics).
    w1f, b1f = _fold_conv_bn(params['w1'], params['b1'], params['s1'], params['t1'])
    w2f, b2f = _fold_conv_bn(params['w2'], params['b2'], params['s2'], params['t2'])
    w1k = _pad_weight(w1f, Cin_p, Cout_p, compute_dtype)
    w2k = _pad_weight(w2f, Cout_p, Cout_p, compute_dtype)
    b1k = _pad_bias(b1f, Cout_p)
    b2k = _pad_bias(b2f, Cout_p)
    if not identity_res:
        wdf = params['wd'] * params['sd'][None, :]
        bdf = params['bd'] * params['sd'] + params['td']
        wdk = _pad_weight(wdf[None], Cin_p, Cout_p, compute_dtype)
        bdk = _pad_bias(bdf, Cout_p)

    # ---- tile the length axis; build overlapping halo windows (halo = 2*pad/side) ----
    TL = _round_up(min(int(tile_l), L), 8)
    nT = -(-L // TL)
    Lo = nT * TL
    TLw = TL + 4 * pad

    # TODO(synk): when stacking TemporalBlocks, keep activations channels-last across
    # the whole network so this NCW<->NLC transpose pair happens once, not per block.
    x_blc = jnp.transpose(x_ncw, (0, 2, 1))                                  # (B, L, C_in)
    x_pad = jnp.pad(x_blc, ((0, 0), (2 * pad, Lo - L + 2 * pad), (0, Cin_p - C_in)))
    x_pad = x_pad.astype(compute_dtype)
    x_win = jnp.stack([x_pad[:, t0 * TL:t0 * TL + TLw, :] for t0 in range(nT)],
                      axis=1)                                                # (B,nT,TLw,Cin_p)

    ins = [x_win, w1k, b1k, w2k, b2k]
    in_specs = [pl.BlockSpec((None, None, TLw, Cin_p), lambda b, t: (b, t, 0, 0)),
                _const_spec(w1k), _const_spec(b1k),
                _const_spec(w2k), _const_spec(b2k)]
    if not identity_res:
        ins += [wdk, bdk]
        in_specs += [_const_spec(wdk), _const_spec(bdk)]

    # scoped-VMEM budget: double-buffered I/O blocks + params + in-kernel temporaries
    TLh = TL + 2 * pad
    blk = 2 * (TLw * Cin_p * x_win.dtype.itemsize + TL * Cout_p * x_ncw.dtype.itemsize)
    par = 2 * sum(int(a.size) * a.dtype.itemsize for a in ins[1:])
    tmp = 4 * (TLh * K * Cin_p + 2 * TLh * Cout_p + TL * K * Cout_p + 2 * TL * Cout_p)
    vmem_limit = int(min(blk + par + tmp + (8 << 20), 64 << 20))

    kern = functools.partial(_temporal_block_kernel, identity_res=identity_res,
                             K=K, dilation=dilation, pad=pad, TL=TL, L=L)

    out = pl.pallas_call(
        kern,
        out_shape=jax.ShapeDtypeStruct((B, Lo, Cout_p), out_dtype),
        grid_spec=pltpu.PrefetchScalarGridSpec(
            num_scalar_prefetch=0,
            grid=(B, nT),
            in_specs=in_specs,
            out_specs=pl.BlockSpec((None, TL, Cout_p), lambda b, t: (b, t, 0)),
        ),
        compiler_params=pltpu.CompilerParams(
            dimension_semantics=("parallel", "parallel"),
            vmem_limit_bytes=vmem_limit),
    )(*ins)

    return jnp.transpose(out[:, :L, :C_out], (0, 2, 1))                      # back to NCW


# ----------------------------- synthetic parameters -----------------------------
def make_params(key, n_inputs, n_outputs, kernel_size):
    ks = jax.random.split(key, 8)
    eps = 1e-5

    def weight_norm_conv(kv, kg, c_in):
        # PyTorch weight_norm(dim=0): w = g * v / ||v||_{(in,k)}  (kaiming fan_out init)
        fan_out = n_outputs * kernel_size
        v = jax.random.normal(kv, (n_outputs, c_in, kernel_size),
                              jnp.float32) * jnp.sqrt(2.0 / fan_out)
        g = jax.random.uniform(kg, (n_outputs,), jnp.float32, 0.5, 1.5)
        norm = jnp.sqrt(jnp.sum(v * v, axis=(1, 2), keepdims=True))
        w = g[:, None, None] * v / norm                  # (C_out, C_in, K)
        return jnp.transpose(w, (2, 1, 0))               # (K, C_in, C_out)

    def bn(k):
        kg, kb, km, kv = jax.random.split(k, 4)
        gamma = jax.random.uniform(kg, (n_outputs,), jnp.float32, 0.5, 1.5)
        beta = jax.random.normal(kb, (n_outputs,), jnp.float32) * 0.1
        mean = jax.random.normal(km, (n_outputs,), jnp.float32) * 0.1
        var = jax.random.uniform(kv, (n_outputs,), jnp.float32, 0.5, 1.5)
        scale = gamma / jnp.sqrt(var + eps)
        return scale, beta - mean * scale

    p = {'w1': weight_norm_conv(ks[0], ks[1], n_inputs),
         'b1': jnp.zeros((n_outputs,), jnp.float32)}
    p['s1'], p['t1'] = bn(ks[2])
    p['w2'] = weight_norm_conv(ks[3], ks[4], n_outputs)
    p['b2'] = jnp.zeros((n_outputs,), jnp.float32)
    p['s2'], p['t2'] = bn(ks[5])
    if n_inputs != n_outputs:
        p['wd'] = jax.random.normal(ks[6], (n_inputs, n_outputs),
                                    jnp.float32) * jnp.sqrt(2.0 / n_inputs)
        p['bd'] = jnp.zeros((n_outputs,), jnp.float32)
        p['sd'], p['td'] = bn(ks[7])
    return p


# ----------------------------- pure-JAX reference (NCW) -----------------------------
def ref_forward(x, p, *, kernel_size, dilation):
    pad = (kernel_size - 1) * dilation // 2

    def conv(xn, w_kio, b):
        w = jnp.transpose(w_kio, (2, 1, 0))              # (C_out, C_in, K)
        y = lax.conv_general_dilated(xn, w, window_strides=(1,), padding=[(pad, pad)],
                                     rhs_dilation=(dilation,),
                                     dimension_numbers=('NCH', 'OIH', 'NCH'))
        return y + b.reshape(1, -1, 1)

    def bn(y, s, t):
        return y * s.reshape(1, -1, 1) + t.reshape(1, -1, 1)

    h = jnp.maximum(bn(conv(x, p['w1'], p['b1']), p['s1'], p['t1']), 0.0)
    h = jnp.maximum(bn(conv(h, p['w2'], p['b2']), p['s2'], p['t2']), 0.0)
    if 'wd' in p:
        res = jnp.einsum('bcl,cd->bdl', x, p['wd']) + p['bd'].reshape(1, -1, 1)
        res = bn(res, p['sd'], p['td'])
    else:
        res = x
    return h + res


if __name__ == "__main__":
    KSIZE, STRIDE, DIL = 3, 1, 2
    key = jax.random.PRNGKey(0)
    k1, k2, k3, k4 = jax.random.split(key, 4)

    # case 1: C_in != C_out (downsample 1x1 conv + BN path), single length tile
    B, C_IN, C_OUT, L = 2, 4, 8, 16
    x = jax.random.normal(k1, (B, C_IN, L), jnp.float32)
    params = make_params(k2, C_IN, C_OUT, KSIZE)
    out = jax.block_until_ready(temporal_block_forward(
        x, params, kernel_size=KSIZE, stride=STRIDE, dilation=DIL))
    ref = ref_forward(x, params, kernel_size=KSIZE, dilation=DIL)
    assert out.shape == (B, C_OUT, L)
    assert jnp.allclose(out, ref, atol=1e-4, rtol=1e-4), \
        f"case1 max err {jnp.max(jnp.abs(out - ref))}"

    # case 2: identity residual + length axis split into multiple grid tiles (halo path)
    B2, C2, L2 = 2, 8, 16
    x2 = jax.random.normal(k3, (B2, C2, L2), jnp.float32)
    params2 = make_params(k4, C2, C2, KSIZE)
    out2 = jax.block_until_ready(temporal_block_forward(
        x2, params2, kernel_size=KSIZE, stride=STRIDE, dilation=DIL, tile_l=8))
    ref2 = ref_forward(x2, params2, kernel_size=KSIZE, dilation=DIL)
    assert out2.shape == (B2, C2, L2)
    assert jnp.allclose(out2, ref2, atol=1e-4, rtol=1e-4), \
        f"case2 max err {jnp.max(jnp.abs(out2 - ref2))}"

    # case 3: bf16 compute path (v6e/v7x MXU), f32 accumulation + f32 epilogue
    out3 = jax.block_until_ready(temporal_block_forward(
        x, params, kernel_size=KSIZE, stride=STRIDE, dilation=DIL,
        compute_dtype=jnp.bfloat16))
    assert jnp.allclose(out3, ref, atol=1e-1, rtol=1e-1), \
        f"case3 (bf16) max err {jnp.max(jnp.abs(out3 - ref))}"

    print("KERNEL_OK")
</pallas_src>

<mosaic_0001>
module attributes {stable_mosaic.version = 11 : i64} {
  func.func @_temporal_block_kernel(%arg0: i32, %arg1: i32, %arg2: memref<1x1x24x128xf32, #tpu.memory_space<vmem>>, %arg3: memref<384x128xf32, #tpu.memory_space<vmem>>, %arg4: memref<1x128xf32, #tpu.memory_space<vmem>>, %arg5: memref<384x128xf32, #tpu.memory_space<vmem>>, %arg6: memref<1x128xf32, #tpu.memory_space<vmem>>, %arg7: memref<128x128xf32, #tpu.memory_space<vmem>>, %arg8: memref<1x128xf32, #tpu.memory_space<vmem>>, %arg9: memref<1x16x128xf32, #tpu.memory_space<vmem>>) attributes {dimension_semantics = [#tpu.dimension_semantics<parallel>, #tpu.dimension_semantics<parallel>], iteration_bounds = array<i64: 2, 1>, scalar_prefetch = 0 : i64, scratch_operands = 0 : i64, tpu.core_type = #tpu.core_type<tc>, window_params = [{transform_indices = @transform_0, window_bounds = array<i64: 1, 1, 24, 128>}, {pipeline_mode = #tpu.pipeline_mode<synchronous>, transform_indices = @transform_1, window_bounds = array<i64: 384, 128>}, {pipeline_mode = #tpu.pipeline_mode<synchronous>, transform_indices = @transform_2, window_bounds = array<i64: 1, 128>}, {pipeline_mode = #tpu.pipeline_mode<synchronous>, transform_indices = @transform_3, window_bounds = array<i64: 384, 128>}, {pipeline_mode = #tpu.pipeline_mode<synchronous>, transform_indices = @transform_4, window_bounds = array<i64: 1, 128>}, {pipeline_mode = #tpu.pipeline_mode<synchronous>, transform_indices = @transform_5, window_bounds = array<i64: 128, 128>}, {pipeline_mode = #tpu.pipeline_mode<synchronous>, transform_indices = @transform_6, window_bounds = array<i64: 1, 128>}, {transform_indices = @transform_7, window_bounds = array<i64: 1, 16, 128>}]} {
    %c0 = arith.constant 0 : index
    %c0_0 = arith.constant 0 : index
    %c0_1 = arith.constant 0 : index
    %c0_2 = arith.constant 0 : index
    %0 = vector.load %arg2[%c0, %c0_0, %c0_1, %c0_2] : memref<1x1x24x128xf32, #tpu.memory_space<vmem>>, vector<1x1x24x128xf32>
    %1 = vector.shape_cast %0 : vector<1x1x24x128xf32> to vector<24x128xf32>
    %2 = vector.extract_strided_slice %1 {offsets = [0, 0], sizes = [20, 128], strides = [1, 1]} : vector<24x128xf32> to vector<20x128xf32>
    %3 = vector.extract_strided_slice %1 {offsets = [2, 0], sizes = [20, 128], strides = [1, 1]} : vector<24x128xf32> to vector<20x128xf32>
    %4 = vector.extract_strided_slice %1 {offsets = [4, 0], sizes = [20, 128], strides = [1, 1]} : vector<24x128xf32> to vector<20x128xf32>
    %5 = tpu.concatenate %2, %3, %4 in 1 : vector<20x128xf32>, vector<20x128xf32>, vector<20x128xf32> -> vector<20x384xf32>
    %c0_3 = arith.constant 0 : index
    %c0_4 = arith.constant 0 : index
    %6 = vector.load %arg3[%c0_3, %c0_4] : memref<384x128xf32, #tpu.memory_space<vmem>>, vector<384x128xf32>
    %cst = arith.constant dense<0.000000e+00> : vector<20x128xf32>
    %7 = tpu.matmul %5, %6, %cst {dimension_numbers = #tpu.dot_dimension_numbers<[1], [0], [0], [1], [0, 0, 1, 1], [], []>} : vector<20x384xf32>, vector<384x128xf32>, vector<20x128xf32> -> vector<20x128xf32>
    %c0_5 = arith.constant 0 : index
    %c0_6 = arith.constant 0 : index
    %8 = vector.load %arg4[%c0_5, %c0_6] : memref<1x128xf32, #tpu.memory_space<vmem>>, vector<1x128xf32>
    %9 = vector.broadcast %8 : vector<1x128xf32> to vector<20x128xf32>
    %10 = arith.addf %7, %9 : vector<20x128xf32>
    %cst_7 = arith.constant 0.000000e+00 : f32
    %11 = vector.broadcast %cst_7 : f32 to vector<20x128xf32>
    %12 = arith.maximumf %10, %11 : vector<20x128xf32>
    %c16_i32 = arith.constant 16 : i32
    %13 = arith.muli %arg1, %c16_i32 : i32
    %c2_i32 = arith.constant 2 : i32
    %14 = arith.subi %13, %c2_i32 : i32
    %15 = tpu.iota {dimensions = array<i32: 0>} : vector<20x1xi32>
    %16 = vector.broadcast %14 : i32 to vector<20x1xi32>
    %17 = arith.addi %16, %15 : vector<20x1xi32>
    %c0_i32 = arith.constant 0 : i32
    %18 = vector.broadcast %c0_i32 : i32 to vector<20x1xi32>
    %19 = arith.cmpi sge, %17, %18 : vector<20x1xi32>
    %c16_i32_8 = arith.constant 16 : i32
    %20 = vector.broadcast %c16_i32_8 : i32 to vector<20x1xi32>
    %21 = arith.cmpi slt, %17, %20 : vector<20x1xi32>
    %22 = arith.andi %19, %21 : vector<20x1xi1>
    %cst_9 = arith.constant 0.000000e+00 : f32
    %23 = vector.shape_cast %22 : vector<20x1xi1> to vector<20x1xi1>
    %24 = vector.broadcast %23 : vector<20x1xi1> to vector<20x128xi1>
    %25 = vector.broadcast %cst_9 : f32 to vector<20x128xf32>
    %26 = arith.select %24, %12, %25 : vector<20x128xi1>, vector<20x128xf32>
    %27 = vector.extract_strided_slice %26 {offsets = [0, 0], sizes = [16, 128], strides = [1, 1]} : vector<20x128xf32> to vector<16x128xf32>
    %28 = vector.extract_strided_slice %26 {offsets = [2, 0], sizes = [16, 128], strides = [1, 1]} : vector<20x128xf32> to vector<16x128xf32>
    %29 = vector.extract_strided_slice %26 {offsets = [4, 0], sizes = [16, 128], strides = [1, 1]} : vector<20x128xf32> to vector<16x128xf32>
    %30 = tpu.concatenate %27, %28, %29 in 1 : vector<16x128xf32>, vector<16x128xf32>, vector<16x128xf32> -> vector<16x384xf32>
    %c0_10 = arith.constant 0 : index
    %c0_11 = arith.constant 0 : index
    %31 = vector.load %arg5[%c0_10, %c0_11] : memref<384x128xf32, #tpu.memory_space<vmem>>, vector<384x128xf32>
    %cst_12 = arith.constant dense<0.000000e+00> : vector<16x128xf32>
    %32 = tpu.matmul %30, %31, %cst_12 {dimension_numbers = #tpu.dot_dimension_numbers<[1], [0], [0], [1], [0, 0, 1, 1], [], []>} : vector<16x384xf32>, vector<384x128xf32>, vector<16x128xf32> -> vector<16x128xf32>
    %c0_13 = arith.constant 0 : index
    %c0_14 = arith.constant 0 : index
    %33 = vector.load %arg6[%c0_13, %c0_14] : memref<1x128xf32, #tpu.memory_space<vmem>>, vector<1x128xf32>
    %34 = vector.broadcast %33 : vector<1x128xf32> to vector<16x128xf32>
    %35 = arith.addf %32, %34 : vector<16x128xf32>
    %cst_15 = arith.constant 0.000000e+00 : f32
    %36 = vector.broadcast %cst_15 : f32 to vector<16x128xf32>
    %37 = arith.maximumf %35, %36 : vector<16x128xf32>
    %38 = vector.extract_strided_slice %1 {offsets = [4, 0], sizes = [16, 128], strides = [1, 1]} : vector<24x128xf32> to vector<16x128xf32>
    %c0_16 = arith.constant 0 : index
    %c0_17 = arith.constant 0 : index
    %39 = vector.load %arg7[%c0_16, %c0_17] : memref<128x128xf32, #tpu.memory_space<vmem>>, vector<128x128xf32>
    %cst_18 = arith.constant dense<0.000000e+00> : vector<16x128xf32>
    %40 = tpu.matmul %38, %39, %cst_18 {dimension_numbers = #tpu.dot_dimension_numbers<[1], [0], [0], [1], [0, 0, 1, 1], [], []>} : vector<16x128xf32>, vector<128x128xf32>, vector<16x128xf32> -> vector<16x128xf32>
    %c0_19 = arith.constant 0 : index
    %c0_20 = arith.constant 0 : index
    %41 = vector.load %arg8[%c0_19, %c0_20] : memref<1x128xf32, #tpu.memory_space<vmem>>, vector<1x128xf32>
    %42 = vector.broadcast %41 : vector<1x128xf32> to vector<16x128xf32>
    %43 = arith.addf %40, %42 : vector<16x128xf32>
    %44 = arith.addf %37, %43 : vector<16x128xf32>
    %c0_21 = arith.constant 0 : index
    %c0_22 = arith.constant 0 : index
    %c0_23 = arith.constant 0 : index
    %45 = vector.load %arg9[%c0_21, %c0_22, %c0_23] : memref<1x16x128xf32, #tpu.memory_space<vmem>>, vector<1x16x128xf32>
    %46 = vector.shape_cast %45 : vector<1x16x128xf32> to vector<16x128xf32>
    %47 = vector.shape_cast %44 : vector<16x128xf32> to vector<1x16x128xf32>
    tpu.vector_store %arg9[%c0_21, %c0_22, %c0_23], %47 {strides = array<i32>} : memref<1x16x128xf32, #tpu.memory_space<vmem>>, vector<1x16x128xf32>,
    return
  }
  func.func @transform_0(%arg0: i32, %arg1: i32) -> (i32, i32, i32, i32) {
    %c0_i32 = arith.constant 0 : i32
    %c0_i32_0 = arith.constant 0 : i32
    %c0_i32_1 = arith.constant 0 : i32
    return %arg0, %arg1, %c0_i32, %c0_i32_0 : i32, i32, i32, i32
  }
  func.func @transform_1(%arg0: i32, %arg1: i32) -> (i32, i32) {
    %c0_i32 = arith.constant 0 : i32
    %c0_i32_0 = arith.constant 0 : i32
    %c0_i32_1 = arith.constant 0 : i32
    return %c0_i32, %c0_i32_0 : i32, i32
  }
  func.func @transform_2(%arg0: i32, %arg1: i32) -> (i32, i32) {
    %c0_i32 = arith.constant 0 : i32
    %c0_i32_0 = arith.constant 0 : i32
    %c0_i32_1 = arith.constant 0 : i32
    return %c0_i32, %c0_i32_0 : i32, i32
  }
  func.func @transform_3(%arg0: i32, %arg1: i32) -> (i32, i32) {
    %c0_i32 = arith.constant 0 : i32
    %c0_i32_0 = arith.constant 0 : i32
    %c0_i32_1 = arith.constant 0 : i32
    return %c0_i32, %c0_i32_0 : i32, i32
  }
  func.func @transform_4(%arg0: i32, %arg1: i32) -> (i32, i32) {
    %c0_i32 = arith.constant 0 : i32
    %c0_i32_0 = arith.constant 0 : i32
    %c0_i32_1 = arith.constant 0 : i32
    return %c0_i32, %c0_i32_0 : i32, i32
  }
  func.func @transform_5(%arg0: i32, %arg1: i32) -> (i32, i32) {
    %c0_i32 = arith.constant 0 : i32
    %c0_i32_0 = arith.constant 0 : i32
    %c0_i32_1 = arith.constant 0 : i32
    return %c0_i32, %c0_i32_0 : i32, i32
  }
  func.func @transform_6(%arg0: i32, %arg1: i32) -> (i32, i32) {
    %c0_i32 = arith.constant 0 : i32
    %c0_i32_0 = arith.constant 0 : i32
    %c0_i32_1 = arith.constant 0 : i32
    return %c0_i32, %c0_i32_0 : i32, i32
  }
  func.func @transform_7(%arg0: i32, %arg1: i32) -> (i32, i32, i32) {
    %c0_i32 = arith.constant 0 : i32
    %c0_i32_0 = arith.constant 0 : i32
    return %arg0, %arg1, %c0_i32 : i32, i32, i32
  }
}

</mosaic_0001>

<bundles_post_ra>
// kernel: tpu_custom_call.1
= control target key start
LH: loop header
LB: loop body
LE: loop exit
PB: predicated region body
PF: predicated region fallthrough
CT: control target
= control target key end

     0   :  { %s2225_s0 = inlined_call_operand.hbm [shape: f32[2,1,24,128], index: 0, kind: input, shape index: {}]   ;;  %s2226_s1 = inlined_call_operand.hbm [shape: f32[384,128], index: 1, kind: input, shape index: {}]   ;;  %s2227_s2 = inlined_call_operand.vmem [shape: f32[1,128], index: 2, kind: input, shape index: {}]   ;;  %s2228_s3 = inlined_call_operand.hbm [shape: f32[384,128], index: 3, kind: input, shape index: {}]   ;;  %s2229_s4 = inlined_call_operand.vmem [shape: f32[1,128], index: 4, kind: input, shape index: {}]   ;;  %s2230_s5 = inlined_call_operand.hbm [shape: f32[128,128], index: 5, kind: input, shape index: {}]   ;;  %s2231_s6 = inlined_call_operand.vmem [shape: f32[1,128], index: 6, kind: input, shape index: {}]   ;;  %s2232_s7 = inlined_call_operand.hbm [shape: f32[2,16,128], index: 7, kind: output, shape index: {}]  }
   0x1   :  { %2241 = sst [smem:[#allocation17_spill]] %s2231_s6 }
   0x2   :  { %2242 = sst [smem:[#allocation18_spill]] %s2232_s7 }
   0x3   :  { %12 = vsyncpa [#allocation3], 0 }
   0x4   :  { %14 = vsyncpa [#allocation3 + $0x1], 0 }
   0x5   :  { %15 = vsyncpa [#allocation6], 0 }
   0x6   :  { %16 = vsyncpa [#allocation9], 0 }
   0x7   :  { %17 = vsyncpa [#allocation4], 0 }
   0x8   :  { %19 = vsyncpa [#allocation4 + $0x1], 0  ;;  %s1869_s24 = smov 0   ;;  %s1871_s25 = smov 0  }
   0x9   :  { %s1873_s26 = smov 0   ;;  %s1875_s27 = smov 0  }
   0xa   :  { %s1877_s28 = smov 0   ;;  %s1879_s29 = smov 0  }
   0xb LB: > { %2243 = sst [smem:[#allocation15_spill]] %s1795_s24  ;;  %s1088_s30 = sadd.s32 4294967295, %s1815_s29   ;;  %s1815_s29 = sphi %s1879_s29, %s25_s29   ;;  %s1811_s28 = sphi %s1877_s28, %s2269_s28   ;;  %s1807_s27 = sphi %s1875_s27, %s2268_s27   ;;  %s1803_s26 = sphi %s1873_s26, %s2267_s26   ;;  %s1799_s25 = sphi %s1871_s25, %s2266_s25   ;;  %s1795_s24 = sphi %s1869_s24, %s2265_s24  }
   0xc   : > { %s1089_s8 = sadd.s32 4294967294, %s1815_s29   ;;  %p59_p0 = scmp.ne.s32.totalorder %s1799_s25, %s1795_s24 }
   0xd   : > { %p1903_p1 = scmp.eq.s32.totalorder %s1088_s30, 0  ;;  %p1907_p2 = scmp.eq.s32.totalorder %s1088_s30, 1 }
   0xe   : > { %p217_p3 = scmp.eq.s32.totalorder %s1089_s8, 1  ;;  %p1090_p5 = scmp.ge.s32.totalorder %s1815_s29, 1 }
   0xf   : > { %s2244_s9 = scalar_select %p1903_p1, 1, 0 }
  0x10   : > { %s2245_s10 = scalar_select %p1907_p2, 1, 0 }
  0x11   : > { %p1913_p4 = por %p1903_p1, %p59_p0  ;;  %p1918_p6 = por %p217_p3, %p59_p0 }
  0x12   : > { %p224_p7 = scmp.lt.s32.totalorder %s1815_s29, 3  ;;  %s1817_s14 = smov [#allocation5]  }
  0x13   : > { %s2246_s11 = scalar_select %p1913_p4, 1, 0 }
  0x14   : > { %s2247_s12 = scalar_select %p1918_p6, 1, 0 }
  0x15   : > { %p1923_p8 = pnand %p1090_p5, %p224_p7  ;;  %s236_s15 = sshll.u32 %s1817_s14, 4  ;;  %s1927_s15 = int_to_ptr.vmem [resolvable:$true] %s236_s15 }
  0x16   : > { %2248 = sst [smem:[#allocation16_spill]] %s2247_s12  ;;  %s1818_s17 = smov [#allocation7]  }
  0x17   : > { %s2249_s13 = scalar_select %p1923_p8, 1, 0 }
  0x18   : > { %p1527_p9 = pneg %p1923_p8  ;;  %s252_s18 = sshll.u32 %s1818_s17, 4  ;;  %s1938_s18 = int_to_ptr.vmem [resolvable:$true] %s252_s18 }
  0x19   : > { %s1819_s19 = smov [#allocation8]   ;;  %s1611_s23 = scalar_lea.hbm %s2226_s1, 6144 }
  0x1a   : > { %p1934_p11 = pnand %p1527_p9, %p1903_p1  ;;  %s1940_s20 = sshll.u32 %s1819_s19, 4  ;;  %s269_s20 = int_to_ptr.vmem [resolvable:$true] %s1940_s20 }
  0x1b   : > { %p1612_p12 = scmp.ne.s32.totalorder %s2226_s1, %s1611_s23  ;;  %p1618_p5 = scmp.lt.u32.totalorder %s1611_s23, %s2226_s1 }
  0x1c   : > { %p1950_p13 = pneg %p1934_p11 }
  0x1e   : > { %p1614_p0 = pnand %p1950_p13, %p1612_p12 }
  0x20   : > { %p1615_p3 = pneg %p1614_p0 }
  0x22   : > { %p1620_p7 = pnand %p1618_p5, %p1615_p3 }
  0x24   : > { %1623 = shalt.err (!%p1620_p7)
}
  0x25   : > { %s1624_s21 = scalar_lea.vmem %s1927_s15, 6144  ;;  %p1632_p1 = scmp.lt.s32.totalorder %s1927_s15, %s1927_s15 }
  0x26   : > { %p1625_p9 = scmp.ne.s32.totalorder %s1927_s15, %s1624_s21  ;;  %p1633_p4 = scmp.lt.s32.totalorder %s1624_s21, %s1624_s21 }
  0x28   : > { %p1627_p10 = pnand %p1625_p9, %p1950_p13  ;;  %p1634_p12 = por %p1633_p4, %p1632_p1 }
  0x2a   : > { %p1628_p6 = pneg %p1627_p10 }
  0x2c   : > { %p1635_p0 = pnand %p1634_p12, %p1628_p6 }
  0x2e   : > { %1638 = shalt.err (!%p1635_p0)
}
  0x2f   : > { %s2240_s22 = smov 128   ;;  %s1821_s23 = smov 8  }
  0x30   : > { %1530 = dma.hbm_to_vmem [thread:$0]  (!%p1934_p11), %s2226_s1, 6144, %s1927_s15, [#allocation6], %s2240_s22, %s2240_s22, %s1821_s23  }
  0x31   : > { %s1639_s21 = scalar_lea.hbm %s2228_s3, 6144 }
  0x32   : > { %p1640_p1 = scmp.ne.s32.totalorder %s2228_s3, %s1639_s21  ;;  %p1646_p10 = scmp.lt.u32.totalorder %s1639_s21, %s2228_s3 }
  0x34   : > { %p1642_p4 = pnand %p1640_p1, %p1950_p13 }
  0x36   : > { %p1643_p6 = pneg %p1642_p4 }
  0x38   : > { %p1648_p3 = pnand %p1646_p10, %p1643_p6 }
  0x3a   : > { %1651 = shalt.err (!%p1648_p3)
}
  0x3b   : > { %s1652_s15 = scalar_lea.vmem %s1938_s18, 6144  ;;  %p1660_p12 = scmp.lt.s32.totalorder %s1938_s18, %s1938_s18 }
  0x3c   : > { %p1653_p5 = scmp.ne.s32.totalorder %s1938_s18, %s1652_s15  ;;  %p1661_p0 = scmp.lt.s32.totalorder %s1652_s15, %s1652_s15 }
  0x3e   : > { %p1655_p7 = pnand %p1653_p5, %p1950_p13  ;;  %p1662_p1 = por %p1661_p0, %p1660_p12 }
  0x40   : > { %p1656_p9 = pneg %p1655_p7 }
  0x42   : > { %p1663_p4 = pnand %p1662_p1, %p1656_p9 }
  0x44   : > { %1666 = shalt.err (!%p1663_p4)
}
  0x45   : > { %1533 = dma.hbm_to_vmem [thread:$0]  (!%p1934_p11), %s2228_s3, 6144, %s1938_s18, [#allocation6], %s2240_s22, %s2240_s22, %s1821_s23  }
  0x46   : > { %s1667_s30 = scalar_lea.hbm %s2230_s5, 2048 }
  0x47   : > { %p1668_p6 = scmp.ne.s32.totalorder %s2230_s5, %s1667_s30  ;;  %p1674_p5 = scmp.lt.u32.totalorder %s1667_s30, %s2230_s5 }
  0x49   : > { %p1670_p10 = pnand %p1668_p6, %p1950_p13 }
  0x4b   : > { %p1671_p3 = pneg %p1670_p10 }
  0x4d   : > { %p1676_p7 = pnand %p1674_p5, %p1671_p3 }
  0x4f   : > { %1679 = shalt.err (!%p1676_p7)
}
  0x50   : > { %s1680_s15 = scalar_lea.vmem %s269_s20, 2048  ;;  %p1688_p1 = scmp.lt.s32.totalorder %s269_s20, %s269_s20 }
  0x51   : > { %p1681_p9 = scmp.ne.s32.totalorder %s269_s20, %s1680_s15  ;;  %p1689_p4 = scmp.lt.s32.totalorder %s1680_s15, %s1680_s15 }
  0x53   : > { %p1683_p12 = pnand %p1681_p9, %p1950_p13  ;;  %p1690_p8 = por %p1689_p4, %p1688_p1 }
  0x55   : > { %p1684_p0 = pneg %p1683_p12 }
  0x57   : > { %p1691_p2 = pnand %p1690_p8, %p1684_p0 }
  0x59   : > { %1694 = shalt.err (!%p1691_p2)
}
  0x5a   : > { %1536 = dma.hbm_to_vmem [thread:$0]  (!%p1934_p11), %s2230_s5, 2048, %s269_s20, [#allocation9], %s2240_s22, %s2240_s22, %s1821_s23  }
  0x5b   : > { %s46_s14 = sadd.s32 1, %s1803_s26  ;;  %s37_s16 = sadd.s32 1, %s1811_s28 }
  0x5c   : > { %p53_p2 = scmp.ne.s32.totalorder %s1803_s26, %s1799_s25  ;;  %p39_p8 = scmp.ge.s32.totalorder %s37_s16, 2 }
  0x5d   : > { %p54_p13 = scmp.eq.s32.totalorder %s1815_s29, 0  ;;  %p2252_p6 = scmp.ne.s32.totalorder %s2245_s10, 0 }
  0x5e   : > { %p1548_p3 = scmp.lt.s32.totalorder %s1815_s29, 2  ;;  %s2271_s16 = smov (%p39_p8, %s37_s16), 0 }
  0x5f   : > { %p2029_p10 = por %p2252_p6, %p53_p2  ;;  %p55_p5 = por %p54_p13, %p53_p2 }
  0x60   : > { %s285_s24 = sand.u32 1, %s1803_s26   ;;  %s41_s12 = ssub.s32 %s1811_s28, %s2271_s16 }
  0x61   : > { %p44_p7 = scmp.eq.s32.totalorder %s41_s12, 0  ;;  %s1508_s20 = smul.u32 24, %s285_s24 }
  0x62   : > { %s1509_s30 = smul.u32 384, %s1811_s28  ;;  %p2040_p11 = pnand %p1548_p3, %p55_p5 }
  0x63   : > { %s2045_s10 = scalar_select %p44_p7, %s1803_s26, %s46_s14  }
  0x64   : > { %s2050_s21 = scalar_lea.hbm %s2225_s0, %s1509_s30  ;;  %s289_s15 = scalar_lea.vmem [#allocation2], %s1508_s20 }
  0x65   : > { %s298_s18 = sshll.u32 %s289_s15, 4  ;;  %s2054_s6 = scalar_lea.sflag [#allocation3], %s285_s24  ;;  %s2052_s18 = int_to_ptr.vmem [resolvable:$true] %s298_s18 }
  0x66   : > { %s1695_s12 = scalar_lea.hbm %s2050_s21, 384  ;;  %p1697_p12 = pneg %p2040_p11 }
  0x67   : > { %p1696_p9 = scmp.ne.s32.totalorder %s2050_s21, %s1695_s12  ;;  %s1700_s17 = scalar_lea.hbm %s2225_s0, 768 }
  0x68   : > { %p1701_p4 = scmp.lt.u32.totalorder %s2050_s21, %s2225_s0  ;;  %p1702_p2 = scmp.lt.u32.totalorder %s1700_s17, %s1695_s12 }
  0x69   : > { %p1698_p0 = pnand %p1697_p12, %p1696_p9  ;;  %p1704_p13 = scmp.lt.u32.totalorder %s1695_s12, %s2050_s21 }
  0x6a   : > { %p1703_p8 = por %p1702_p2, %p1701_p4 }
  0x6b   : > { %p1699_p1 = pneg %p1698_p0 }
  0x6c   : > { %p1705_p6 = por %p1704_p13, %p1703_p8 }
  0x6e   : > { %p1706_p3 = pnand %p1705_p6, %p1699_p1 }
  0x70   : > { %1709 = shalt.err (!%p1706_p3)
}
  0x71   : > { %s1710_s24 = scalar_lea.vmem %s2052_s18, 384  ;;  %s1822_s20 = smov [#allocation2]  }
  0x72   : > { %p1711_p5 = scmp.ne.s32.totalorder %s2052_s18, %s1710_s24  ;;  %s1715_s15 = sshll.u32 %s1822_s20, 4  ;;  %s1716_s15 = int_to_ptr.vmem [resolvable:$false] %s1715_s15 }
  0x73   : > { %s1717_s22 = scalar_lea.vmem %s1716_s15, 768  ;;  %p1718_p0 = scmp.lt.s32.totalorder %s2052_s18, %s1716_s15 }
  0x74   : > { %p1713_p7 = pnand %p1711_p5, %p1697_p12  ;;  %p1719_p4 = scmp.lt.s32.totalorder %s1717_s22, %s1710_s24 }
  0x76   : > { %p1714_p9 = pneg %p1713_p7  ;;  %p1720_p2 = por %p1719_p4, %p1718_p0 }
  0x78   : > { %p1721_p8 = pnand %p1720_p2, %p1714_p9 }
  0x7a   : > { %1724 = shalt.err (!%p1721_p8)
}
  0x7b   : > { %s2255_s12 = smov 128   ;;  %p2256_p12 = scmp.ne.s32.totalorder %s2249_s13, 0 }
  0x7c   : > { %1540 = dma.hbm_to_vmem [thread:$0]  (!%p2040_p11), %s2050_s21, 384, %s2052_s18, %s2054_s6, %s2255_s12, %s2255_s12, %s1821_s23  }
  0x7d   : > { %310 = sbr.rel (%p2256_p12) target bundleno = 667 (0x29b), region = 48  ;;  %s2088_s14 = sand.u32 (!%p2256_p12), 1, %s1799_s25  }
  0x7e   : > { %s1510_s30 = smul.u32 (!%p2256_p12), 24, %s2088_s14  ;;  %s313_s17 = scalar_lea.sflag (!%p2256_p12), [#allocation3], %s2088_s14 }
  0x7f   : > { %p2257_p1 = scmp.ne.s32.totalorder (!%p2256_p12), %s2246_s11, 0 }
  0x80   : > { %s2092_s19 = scalar_lea.vmem (!%p2256_p12), [#allocation2], %s1510_s30 }
  0x84   : > { %1778 = dma.done.wait (%p2257_p1), %s313_s17, 384  }
  0x85   : > { %1780 = vsyncadd (%p2257_p1), %s313_s17, 4294966912  ;;  %p2258_p11 = scmp.ne.s32.totalorder %s2244_s9, 0 }
  0x87   : > { %1782 = dma.done.wait (%p2258_p11), [#allocation6], 12288  }
  0x88   : > { %1784 = vsyncadd (%p2258_p11), [#allocation6], 4294955008 }
  0x89   : > { %1786 = dma.done.wait (%p2258_p11), [#allocation9], 2048  }
  0x8a   : > { %1788 = vsyncadd (%p2258_p11), [#allocation9], 4294965248  ;;  %v1823_v0 = vmov 0.0|0.0   ;;  %vm1824_vm0 = vmmov 0   ;;  %v1825_v1 = vmov 0.0   ;;  %v400_v2 = vld [vmem:[#allocation5 + $0x80] sm:$0xff] }
  0x8b   : > { %1388 = vmatprep.subr.bf16.mxu1 %v1823_v0  ;;  %1277 = vmatprep.mubr.msk.f32.mxu1 %vm1824_vm0, %v1825_v1  ;;  %v401_v3 = vld [vmem:[#allocation5 + $0x88] sm:$0xff]  ;;  %v384_v4 = vld [vmem:[#allocation5] sm:$0xff]  ;;  %v402_v7 = vld [vmem:[#allocation5 + $0x90] sm:$0xff]  ;;  %vm366_vm1 = vcmask 1045504   ;;  %vm375_vm2 = vcmask 1043456   ;;  %s1100_s8 = sshll.u32 %s2088_s14, 4 }
  0x8c   : > { %v1356_v5 = vpack.c.bf16 %v401_v3, %v400_v2  ;;  %v385_v6 = vld [vmem:[#allocation5 + $0x8] sm:$0xff]  ;;  %v403_v8 = vld [vmem:[#allocation5 + $0x98] sm:$0xff]  ;;  %v386_v11 = vld [vmem:[#allocation5 + $0x10] sm:$0xff]  ;;  %s2259_s6 = sld [smem:[#allocation17_spill]]  ;;  %s358_s24 = scalar_lea.vmem [#allocation10], %s1100_s8 }
  0x8d   : > { %v1358_v9 = vpack.c.bf16 %v385_v6, %v384_v4  ;;  %v1360_v10 = vpack.c.bf16 %v403_v8, %v402_v7  ;;  %v387_v12 = vld [vmem:[#allocation5 + $0x18] sm:$0xff]  ;;  %v416_v13 = vld [vmem:[#allocation5 + $0x100] sm:$0xff]  ;;  %v417_v14 = vld [vmem:[#allocation5 + $0x108] sm:$0xff]  ;;  %s972_s20 = sshll.u32 %s358_s24, 4  ;;  %s1110_s15 = sshll.u32 %s1807_s27, 8  ;;  %s2171_s20 = int_to_ptr.vmem [resolvable:$true] %s972_s20 }
  0x8e   : > { %1357 = vmatprep.subr.bf16.mxu0 %v1356_v5  ;;  %v404_v15 = vld [vmem:[#allocation5 + $0xa0] sm:$0xff]  ;;  %v405_v16 = vld [vmem:[#allocation5 + $0xa8] sm:$0xff]  ;;  %v1362_v17 = vpack.c.bf16 %v387_v12, %v386_v11  ;;  %v1389_v18 = vpack.c.bf16 %v417_v14, %v416_v13  ;;  %v418_v19 = vld [vmem:[#allocation5 + $0x110] sm:$0xff]  ;;  %s2260_s30 = sld [smem:[#allocation18_spill]]  ;;  %s957_s27 = scalar_lea.sflag [#allocation4], %s2088_s14 }
  0x8f   : > { %1359 = vmatpush3.bf16.msra.mxu0 %v1358_v9  ;;  %v1364_v20 = vpack.c.bf16 %v405_v16, %v404_v15  ;;  %v388_v21 = vld [vmem:[#allocation5 + $0x20] sm:$0xff]  ;;  %v389_v22 = vld [vmem:[#allocation5 + $0x28] sm:$0xff]  ;;  %v419_v23 = vld [vmem:[#allocation5 + $0x118] sm:$0xff]  ;;  %s1826_s9 = smov [#allocation10]  }
  0x90   : > { %1361 = vmatprep.subr.bf16.mxu0 %v1360_v10  ;;  %1390 = vmatpush3.bf16.msra.mxu1 %v1389_v18  ;;  %v1392_v24 = vpack.c.bf16 %v419_v23, %v418_v19  ;;  %v406_v25 = vld [vmem:[#allocation5 + $0xb0] sm:$0xff]  ;;  %v407_v26 = vld [vmem:[#allocation5 + $0xb8] sm:$0xff]  ;;  %v420_v27 = vld [vmem:[#allocation5 + $0x120] sm:$0xff]  ;;  %v1366_v29 = vpack.c.bf16 %v389_v22, %v388_v21  ;;  %s1729_s11 = sshll.u32 %s1826_s9, 4  ;;  %s1730_s11 = int_to_ptr.vmem [resolvable:$false] %s1729_s11 }
  0x91   : > { %1391 = vmatprep.subr.bf16.mxu1 %v1823_v0  ;;  %v421_v28 = vld [vmem:[#allocation5 + $0x128] sm:$0xff]  ;;  %v1368_v30 = vpack.c.bf16 %v407_v26, %v406_v25  ;;  %v390_v31 = vld [vmem:[#allocation5 + $0x30] sm:$0xff]  ;;  %v391_v32 = vld [vmem:[#allocation5 + $0x38] sm:$0xff]  ;;  %s1731_s13 = scalar_lea.vmem %s1730_s11, 512  ;;  %p1732_p5 = scmp.lt.s32.totalorder %s2171_s20, %s1730_s11 }
  0x92   : > { %v1395_v33 = vpack.c.bf16 %v421_v28, %v420_v27  ;;  %v408_v34 = vld [vmem:[#allocation5 + $0xc0] sm:$0xff]  ;;  %v409_v35 = vld [vmem:[#allocation5 + $0xc8] sm:$0xff]  ;;  %v422_v36 = vld [vmem:[#allocation5 + $0x130] sm:$0xff]  ;;  %v1370_v38 = vpack.c.bf16 %v391_v32, %v390_v31 }
  0x93   : > { %1363 = vmatpush3.bf16.msra.mxu0 %v1362_v17  ;;  %v423_v37 = vld [vmem:[#allocation5 + $0x138] sm:$0xff]  ;;  %v1372_v39 = vpack.c.bf16 %v409_v35, %v408_v34  ;;  %v392_v40 = vld [vmem:[#allocation5 + $0x40] sm:$0xff]  ;;  %v393_v41 = vld [vmem:[#allocation5 + $0x48] sm:$0xff] }
  0x94   : > { %1365 = vmatprep.subr.bf16.mxu0 %v1364_v20  ;;  %1393 = vmatpush3.bf16.msra.mxu1 %v1392_v24  ;;  %v1398_v42 = vpack.c.bf16 %v423_v37, %v422_v36  ;;  %v410_v43 = vld [vmem:[#allocation5 + $0xd0] sm:$0xff]  ;;  %v411_v44 = vld [vmem:[#allocation5 + $0xd8] sm:$0xff]  ;;  %v424_v45 = vld [vmem:[#allocation5 + $0x140] sm:$0xff]  ;;  %v1374_v49 = vpack.c.bf16 %v393_v41, %v392_v40  ;;  %s2176_s17 = scalar_lea.hbm %s2260_s30, %s1110_s15 }
  0x95   : > { %1394 = vmatprep.subr.bf16.mxu1 %v1823_v0  ;;  %v425_v46 = vld [vmem:[#allocation5 + $0x148] sm:$0xff]  ;;  %v2116_v48 = vld [vmem:[%s2092_s19 + $0x8] sm:$0xff]  ;;  %v1376_v52 = vpack.c.bf16 %v411_v44, %v410_v43  ;;  %v412_v56 = vld [vmem:[#allocation5 + $0xe0] sm:$0xff] }
  0x96   : > { %v2113_v47 = vld [vmem:[%s2092_s19] sm:$0xff]  ;;  %v368_v51 = vrot.slane %v2116_v48, 2  ;;  %v395_v54 = vld [vmem:[#allocation5 + $0x58] sm:$0xff]  ;;  %v1401_v55 = vpack.c.bf16 %v425_v46, %v424_v45  ;;  %v396_v63 = vld [vmem:[#allocation5 + $0x60] sm:$0xff]  ;;  %v377_v27 = vrot.slane %v2116_v48, 4 }
  0x97   : > { %1367 = vmatpush3.bf16.msra.mxu0 %v1366_v29  ;;  %v367_v50 = vrot.slane %v2113_v47, 2  ;;  %v394_v53 = vld [vmem:[#allocation5 + $0x50] sm:$0xff]  ;;  %v413_v57 = vld [vmem:[#allocation5 + $0xe8] sm:$0xff]  ;;  %v427_v60 = vld [vmem:[#allocation5 + $0x158] sm:$0xff]  ;;  %v376_v26 = vrot.slane %v2113_v47, 4 }
  0x98   : > { %1369 = vmatprep.subr.bf16.mxu0 %v1368_v30  ;;  %1396 = vmatpush3.bf16.msra.mxu1 %v1395_v33  ;;  %v426_v59 = vld [vmem:[#allocation5 + $0x150] sm:$0xff]  ;;  %v1378_v61 = vpack.c.bf16 %v395_v54, %v394_v53  ;;  %v1380_v62 = vpack.c.bf16 %v413_v57, %v412_v56  ;;  %v397_v2 = vld [vmem:[#allocation5 + $0x68] sm:$0xff]  ;;  %v415_v5 = vld [vmem:[#allocation5 + $0xf8] sm:$0xff] }
  0x99   : > { %1397 = vmatprep.subr.bf16.mxu1 %v1823_v0  ;;  %v369_v58 = vsel %vm366_vm1, %v367_v50, %v368_v51  ;;  %v1404_v3 = vpack.c.bf16 %v427_v60, %v426_v59  ;;  %v414_v4 = vld [vmem:[#allocation5 + $0xf0] sm:$0xff]  ;;  %v428_v6 = vld [vmem:[#allocation5 + $0x160] sm:$0xff]  ;;  %v429_v7 = vld [vmem:[#allocation5 + $0x168] sm:$0xff]  ;;  %v1382_v8 = vpack.c.bf16 %v397_v2, %v396_v63 }
  0x9a   : > { %503 = vmatprep.mubr.f32.mxu0 %v369_v58  ;;  %v1384_v9 = vpack.c.bf16 %v415_v5, %v414_v4  ;;  %v398_v10 = vld [vmem:[#allocation5 + $0x70] sm:$0xff]  ;;  %v399_v11 = vld [vmem:[#allocation5 + $0x78] sm:$0xff]  ;;  %v1407_v12 = vpack.c.bf16 %v429_v7, %v428_v6  ;;  %v663_v14 = vld [vmem:[#allocation7 + $0x80] sm:$0xff] }
  0x9b   : > { %1371 = vmatpush3.bf16.msra.mxu0 %v1370_v38  ;;  %v2126_v13 = vld [vmem:[%s2092_s19 + $0x10] sm:$0xff]  ;;  %v664_v15 = vld [vmem:[#allocation7 + $0x88] sm:$0xff]  ;;  %v430_v16 = vld [vmem:[#allocation5 + $0x170] sm:$0xff]  ;;  %v1386_v18 = vpack.c.bf16 %v399_v11, %v398_v10  ;;  %v2137_v38 = vsel %vm375_vm2, %v376_v26, %v377_v27  ;;  %s1725_s19 = scalar_lea.vmem %s2171_s20, 256 }
  0x9c   : > { %1373 = vmatprep.subr.bf16.mxu0 %v1372_v39  ;;  %1399 = vmatpush3.bf16.msra.mxu1 %v1398_v42  ;;  %v431_v17 = vld [vmem:[#allocation5 + $0x178] sm:$0xff]  ;;  %v679_v19 = vld [vmem:[#allocation7 + $0x100] sm:$0xff]  ;;  %v680_v20 = vld [vmem:[#allocation7 + $0x108] sm:$0xff]  ;;  %v370_v21 = vrot.slane %v2126_v13, 2  ;;  %v1412_v22 = vpack.c.bf16 %v664_v15, %v663_v14  ;;  %p1726_p13 = scmp.ne.s32.totalorder %s2171_s20, %s1725_s19  ;;  %p1733_p7 = scmp.lt.s32.totalorder %s1731_s13, %s1725_s19 }
  0x9d   : > { %1400 = vmatprep.subr.bf16.mxu1 %v1823_v0  ;;  %v647_v23 = vld [vmem:[#allocation7] sm:$0xff]  ;;  %v648_v24 = vld [vmem:[#allocation7 + $0x8] sm:$0xff]  ;;  %v1410_v25 = vpack.c.bf16 %v431_v17, %v430_v16  ;;  %v665_v28 = vld [vmem:[#allocation7 + $0x90] sm:$0xff]  ;;  %v1444_v30 = vpack.c.bf16 %v680_v20, %v679_v19 }
  0x9e   : > { %v666_v29 = vld [vmem:[#allocation7 + $0x98] sm:$0xff]  ;;  %v1414_v31 = vpack.c.bf16 %v648_v24, %v647_v23  ;;  %v681_v32 = vld [vmem:[#allocation7 + $0x110] sm:$0xff]  ;;  %v371_v34 = vsel %vm366_vm1, %v368_v51, %v370_v21  ;;  %v667_v39 = vld [vmem:[#allocation7 + $0xa0] sm:$0xff]  ;;  %p1727_p6 = pnand %p1726_p13, %p2029_p10  ;;  %p1734_p9 = por %p1733_p7, %p1732_p5 }
  0x9f   : > { %1375 = vmatpush3.bf16.msra.mxu0 %v1374_v49  ;;  %v682_v33 = vld [vmem:[#allocation7 + $0x118] sm:$0xff]  ;;  %v1416_v35 = vpack.c.bf16 %v666_v29, %v665_v28  ;;  %v649_v36 = vld [vmem:[#allocation7 + $0x10] sm:$0xff]  ;;  %v668_v40 = vld [vmem:[#allocation7 + $0xa8] sm:$0xff] }
  0xa0   : > { %1377 = vmatprep.subr.bf16.mxu0 %v1376_v52  ;;  %1402 = vmatpush3.bf16.msra.mxu1 %v1401_v55  ;;  %v650_v37 = vld [vmem:[#allocation7 + $0x18] sm:$0xff]  ;;  %v1448_v41 = vpack.c.bf16 %v682_v33, %v681_v32  ;;  %v683_v43 = vld [vmem:[#allocation7 + $0x120] sm:$0xff]  ;;  %v684_v44 = vld [vmem:[#allocation7 + $0x128] sm:$0xff]  ;;  %v1420_v45 = vpack.c.bf16 %v668_v40, %v667_v39  ;;  %p1728_p3 = pneg %p1727_p6 }
  0xa1   : > { %1403 = vmatprep.subr.bf16.mxu1 %v1823_v0  ;;  %v1418_v42 = vpack.c.bf16 %v650_v37, %v649_v36  ;;  %v651_v46 = vld [vmem:[#allocation7 + $0x20] sm:$0xff]  ;;  %v652_v49 = vld [vmem:[#allocation7 + $0x28] sm:$0xff]  ;;  %v670_v51 = vld [vmem:[#allocation7 + $0xb8] sm:$0xff]  ;;  %v1452_v52 = vpack.c.bf16 %v684_v44, %v683_v43  ;;  %v604_v36 = vlaneseq }
  0xa2   : > { %v1422_v53 = vpack.c.bf16 %v652_v49, %v651_v46  ;;  %v653_v55 = vld [vmem:[#allocation7 + $0x30] sm:$0xff]  ;;  %v654_v56 = vld [vmem:[#allocation7 + $0x38] sm:$0xff]  ;;  %v671_v57 = vld [vmem:[#allocation7 + $0xc0] sm:$0xff]  ;;  %p1735_p0 = pnand %p1734_p9, %p1728_p3 }
  0xa3   : > { %1379 = vmatpush3.bf16.msra.mxu0 %v1378_v61  ;;  %v672_v58 = vld [vmem:[#allocation7 + $0xc8] sm:$0xff]  ;;  %v655_v60 = vld [vmem:[#allocation7 + $0x40] sm:$0xff]  ;;  %v686_v2 = vld [vmem:[#allocation7 + $0x138] sm:$0xff]  ;;  %v605_v37 = vshrl.u32 %v604_v36, 7 }
  0xa4   : > { %1381 = vmatprep.subr.bf16.mxu0 %v1380_v62  ;;  %1405 = vmatpush3.bf16.msra.mxu1 %v1404_v3  ;;  %v1428_v59 = vpack.c.bf16 %v672_v58, %v671_v57  ;;  %v656_v61 = vld [vmem:[#allocation7 + $0x48] sm:$0xff]  ;;  %v685_v62 = vld [vmem:[#allocation7 + $0x130] sm:$0xff]  ;;  %v674_v4 = vld [vmem:[#allocation7 + $0xd8] sm:$0xff] }
  0xa5   : > { %1406 = vmatprep.subr.bf16.mxu1 %v1823_v0  ;;  %v1430_v63 = vpack.c.bf16 %v656_v61, %v655_v60  ;;  %v673_v3 = vld [vmem:[#allocation7 + $0xd0] sm:$0xff]  ;;  %v658_v7 = vld [vmem:[#allocation7 + $0x58] sm:$0xff]  ;;  %v688_v10 = vld [vmem:[#allocation7 + $0x148] sm:$0xff]  ;;  %v609_v43 = vadd.s32 4294967294, %v605_v37 }
  0xa6   : > { %v1432_v5 = vpack.c.bf16 %v674_v4, %v673_v3  ;;  %v657_v6 = vld [vmem:[#allocation7 + $0x50] sm:$0xff]  ;;  %v659_v15 = vld [vmem:[#allocation7 + $0x60] sm:$0xff]  ;;  %v660_v16 = vld [vmem:[#allocation7 + $0x68] sm:$0xff] }
  0xa7   : > { %1383 = vmatpush3.bf16.msra.mxu0 %v1382_v8  ;;  %v1434_v8 = vpack.c.bf16 %v658_v7, %v657_v6  ;;  %v689_v17 = vld [vmem:[#allocation7 + $0x150] sm:$0xff]  ;;  %v690_v19 = vld [vmem:[#allocation7 + $0x158] sm:$0xff]  ;;  %v691_v26 = vld [vmem:[#allocation7 + $0x160] sm:$0xff]  ;;  %vm612_vm3 = vcmp.ge.s32.totalorder %v609_v43, 0 }
  0xa8   : > { %1385 = vmatprep.subr.bf16.mxu0 %v1384_v9  ;;  %1408 = vmatpush3.bf16.msra.mxu1 %v1407_v12  ;;  %v687_v9 = vld [vmem:[#allocation7 + $0x140] sm:$0xff]  ;;  %v1464_v20 = vpack.c.bf16 %v690_v19, %v689_v17  ;;  %v661_v24 = vld [vmem:[#allocation7 + $0x70] sm:$0xff]  ;;  %v692_v28 = vld [vmem:[#allocation7 + $0x168] sm:$0xff] }
  0xa9   : > { %1409 = vmatprep.subr.bf16.mxu1 %v1823_v0  ;;  %v379_v0 = vrot.slane %v2126_v13, 4  ;;  %v1460_v11 = vpack.c.bf16 %v688_v10, %v687_v9  ;;  %v675_v12 = vld [vmem:[#allocation7 + $0xe0] sm:$0xff]  ;;  %v1468_v29 = vpack.c.bf16 %v692_v28, %v691_v26  ;;  %v693_v33 = vld [vmem:[#allocation7 + $0x170] sm:$0xff]  ;;  %v863_v26 = vld [vmem:[#allocation8 + $0x48] sm:$0xff] }
  0xaa   : > { %v1101_v40 = vld [vmem:[%s2227_s2] ss:$0 sm:$0xff] }
  0xab   : > { %1387 = vmatpush3.bf16.msra.mxu0 %v1386_v18  ;;  %v2145_v50 = vsel %vm375_vm2, %v377_v27, %v379_v0  ;;  %v1438_v18 = vpack.c.bf16 %v660_v16, %v659_v15  ;;  %v856_v4 = vld [vmem:[#allocation8 + $0x10] sm:$0xff]  ;;  %v859_v15 = vld [vmem:[#allocation8 + $0x28] sm:$0xff] }
  0xac   : > { %1413 = vmatprep.subr.bf16.mxu0 %v1412_v22  ;;  %1411 = vmatpush3.bf16.msra.mxu1 %v1410_v25  ;;  %v678_v22 = vld [vmem:[#allocation7 + $0xf8] sm:$0xff]  ;;  %v864_v28 = vld [vmem:[#allocation8 + $0x50] sm:$0xff] }
  0xad   : > { %1445 = vmatprep.subr.bf16.mxu1 %v1444_v30  ;;  %v662_v25 = vld [vmem:[#allocation7 + $0x78] sm:$0xff] }
  0xae   : > { %504 = vmatmul.mubr.f32.vlgmr.msra.gmra.mrb[0].mxu0 %v2113_v47  ;;  %v669_v47 = vld [vmem:[#allocation7 + $0xb0] sm:$0xff]  ;;  %v1442_v27 = vpack.c.bf16 %v662_v25, %v661_v24  ;;  %v862_v25 = vld [vmem:[#allocation8 + $0x40] sm:$0xff] }
  0xaf   : > { %508 = vmatprep.mubr.f32.mxu0 %v371_v34  ;;  %1415 = vmatpush3.bf16.msra.mxu0 %v1414_v31  ;;  %v1424_v54 = vpack.c.bf16 %v670_v51, %v669_v47  ;;  %v855_v31 = vld [vmem:[#allocation8 + $0x8] sm:$0xff]  ;;  %v694_v34 = vld [vmem:[#allocation7 + $0x178] sm:$0xff] }
  0xb0   : > { %1278 = vmatmul.mubr.f32.vlgmr.msra.gmra.mrb[0].mxu1 %v2137_v38  ;;  %1417 = vmatprep.subr.bf16.mxu0 %v1416_v35  ;;  %v1472_v35 = vpack.c.bf16 %v694_v34, %v693_v33  ;;  %v868_v34 = vld [vmem:[#allocation8 + $0x70] sm:$0xff] }
  0xb1   : > { %1280 = vmatprep.mubr.msk.f32.mxu1 %vm1824_vm0, %v1825_v1  ;;  %1447 = vmatpush3.bf16.msra.mxu1 %v1444_v30  ;;  %v854_v30 = vld [vmem:[#allocation8] sm:$0xff] }
  0xb2   : > { %509 = vmatmul.mubr.f32.gmra.mrb[2].mxu0 %v2116_v48  ;;  %1449 = vmatprep.subr.bf16.mxu1 %v1448_v41  ;;  %v1426_v48 = vpack.c.bf16 %v654_v56, %v653_v55  ;;  %v1476_v32 = vpack.c.bf16 %v855_v31, %v854_v30  ;;  %v866_v31 = vld [vmem:[#allocation8 + $0x60] sm:$0xff] }
  0xb3   : > { %513 = vmatprep.mubr.f32.mxu0 %v370_v21  ;;  %1419 = vmatpush3.bf16.msra.mxu0 %v1418_v42  ;;  %v677_v21 = vld [vmem:[#allocation7 + $0xf0] sm:$0xff] }
  0xb4   : > { %1281 = vmatmul.mubr.f32.gmra.mrb[2].mxu1 %v2145_v50  ;;  %1421 = vmatprep.subr.bf16.mxu0 %v1420_v45  ;;  %v1440_v23 = vpack.c.bf16 %v678_v22, %v677_v21  ;;  %v860_v22 = vld [vmem:[#allocation8 + $0x30] sm:$0xff] }
  0xb5   : > { %1283 = vmatprep.mubr.msk.f32.mxu1 %vm1824_vm0, %v1825_v1  ;;  %1451 = vmatpush3.bf16.msra.mxu1 %v1448_v41  ;;  %v1456_v1 = vpack.c.bf16 %v686_v2, %v685_v62 }
  0xb6   : > { %514 = vmatmul.mubr.f32.gmra.mrb[4].mxu0 %v2126_v13  ;;  %1453 = vmatprep.subr.bf16.mxu1 %v1452_v52  ;;  %v676_v13 = vld [vmem:[#allocation7 + $0xe8] sm:$0xff] }
  0xb7   : > { %1423 = vmatpush3.bf16.msra.mxu0 %v1422_v53  ;;  %v1436_v14 = vpack.c.bf16 %v676_v13, %v675_v12 }
  0xb8   : > { %1284 = vmatmul.mubr.f32.gmra.mrb[4].mxu1 %v379_v0  ;;  %1425 = vmatprep.subr.bf16.mxu0 %v1424_v54  ;;  %v607_v54 = vadd.s32 16, %v605_v37 }
  0xb9   : > { %1455 = vmatpush3.bf16.msra.mxu1 %v1452_v52 }
  0xba   : > { %1457 = vmatprep.subr.bf16.mxu1 %v1456_v1  ;;  %v611_v62 = vadd.s32 4294967294, %v607_v54 }
  0xbb   : > { %1427 = vmatpush3.bf16.msra.mxu0 %v1426_v48 }
  0xbc   : > { %1429 = vmatprep.subr.bf16.mxu0 %v1428_v59  ;;  %vm617_vm4 = vcmp.lt.s32.totalorder %v611_v62, 16 }
  0xbd   : > { %1459 = vmatpush3.bf16.msra.mxu1 %v1456_v1 }
  0xbe   : > { %1461 = vmatprep.subr.bf16.mxu1 %v1460_v11 }
  0xbf   : > { %1431 = vmatpush3.bf16.msra.mxu0 %v1430_v63 }
  0xc0   : > { %1433 = vmatprep.subr.bf16.mxu0 %v1432_v5  ;;  %v857_v5 = vld [vmem:[#allocation8 + $0x18] sm:$0xff] }
  0xc1   : > { %1463 = vmatpush3.bf16.msra.mxu1 %v1460_v11  ;;  %v1480_v13 = vpack.c.bf16 %v857_v5, %v856_v4 }
  0xc2   : > { %1465 = vmatprep.subr.bf16.mxu1 %v1464_v20 }
  0xc3   : > { %1435 = vmatpush3.bf16.msra.mxu0 %v1434_v8 }
  0xc4   : > { %1437 = vmatprep.subr.bf16.mxu0 %v1436_v14  ;;  %v858_v14 = vld [vmem:[#allocation8 + $0x20] sm:$0xff] }
  0xc5   : > { %1467 = vmatpush3.bf16.msra.mxu1 %v1464_v20  ;;  %v1484_v19 = vpack.c.bf16 %v859_v15, %v858_v14 }
  0xc6   : > { %1469 = vmatprep.subr.bf16.mxu1 %v1468_v29 }
  0xc7   : > { %1439 = vmatpush3.bf16.msra.mxu0 %v1438_v18 }
  0xc8   : > { %1441 = vmatprep.subr.bf16.mxu0 %v1440_v23  ;;  %v861_v23 = vld [vmem:[#allocation8 + $0x38] sm:$0xff] }
  0xc9   : > { %1471 = vmatpush3.bf16.msra.mxu1 %v1468_v29  ;;  %v1488_v24 = vpack.c.bf16 %v861_v23, %v860_v22  ;;  %v865_v29 = vld [vmem:[#allocation8 + $0x58] sm:$0xff] }
  0xca   : > { %1473 = vmatprep.subr.bf16.mxu1 %v1472_v35  ;;  %v1496_v30 = vpack.c.bf16 %v865_v29, %v864_v28 }
  0xcb   : > { %1443 = vmatpush3.bf16.msra.mxu0 %v1442_v27  ;;  %v1492_v27 = vpack.c.bf16 %v863_v26, %v862_v25 }
  0xcc   : > { %1477 = vmatprep.subr.bf16.mxu0 %v1476_v32 }
  0xcd   : > { %1475 = vmatpush3.bf16.msra.mxu1 %v1472_v35  ;;  %v869_v35 = vld [vmem:[#allocation8 + $0x78] sm:$0xff] }
  0xce   : > { %v1504_v36 = vpack.c.bf16 %v869_v35, %v868_v34 }
 0x181   : > { %v1143_v0 = vpop.f32.mrb[0].mxu0 }
 0x182   : > { %v1144_v39 = vpop.f32.mrb[1].mxu0 }
 0x183   : > { %v1145_v41 = vadd.f32 %v1144_v39, %v1143_v0  ;;  %v585_v42 = vpop.f32.mrb[0].mxu1  ;;  %v1102_v0 = vld [vmem:[%s2229_s4] ss:$0 sm:$0xff] }
 0x184   : > { %v1279_v44 = vpop.f32.mrb[1].mxu1 }
 0x185   : > { %v1146_v45 = vpop.f32.mrb[2].mxu0  ;;  %v506_v46 = vadd.f32 %v1145_v41, %v1101_v40 }
 0x186   : > { %v1147_v49 = vpop.f32.mrb[3].mxu0 }
 0x187   : > { %v586_v47 = vadd.f32 %v585_v42, %v506_v46  ;;  %v1148_v51 = vadd.f32 %v1147_v49, %v1146_v45  ;;  %v590_v52 = vpop.f32.mrb[2].mxu1 }
 0x188   : > { %v1282_v53 = vpop.f32.mrb[3].mxu1 }
 0x189   : > { %v599_v55 = vmax.f32 %v586_v47, 0.0  ;;  %v1149_v56 = vpop.f32.mrb[4].mxu0  ;;  %v511_v48 = vadd.f32 %v1148_v51, %v1101_v40 }
 0x18a   : > { %v1150_v57 = vpop.f32.mrb[5].mxu0 }
 0x18b   : > { %v627_v58 = vsel %vm612_vm3, %v599_v55, 0.0  ;;  %v591_v59 = vadd.f32 %v590_v52, %v511_v48  ;;  %v1151_v60 = vadd.f32 %v1150_v57, %v1149_v56  ;;  %v595_v61 = vpop.f32.mrb[4].mxu1 }
 0x18c   : > { %v1285_v63 = vpop.f32.mrb[5].mxu1  ;;  %v633_v3 = vrot.slane %v627_v58, 2  ;;  %v640_v6 = vrot.slane %v627_v58, 4 }
 0x18d   : > { %v600_v2 = vmax.f32 %v591_v59, 0.0  ;;  %v516_v1 = vadd.f32 %v1151_v60, %v1101_v40 }
 0x18f   : > { %v634_v7 = vrot.slane %v600_v2, 2  ;;  %v641_v8 = vrot.slane %v600_v2, 4  ;;  %v596_v9 = vadd.f32 %v595_v61, %v516_v1 }
 0x191   : > { %v601_v10 = vmax.f32 %v596_v9, 0.0  ;;  %v635_v11 = vsel %vm366_vm1, %v633_v3, %v634_v7  ;;  %v642_v12 = vsel %vm375_vm2, %v640_v6, %v641_v8 }
 0x192   : > { %766 = vmatprep.mubr.f32.mxu0 %v635_v11  ;;  %1318 = vmatprep.mubr.f32.mxu1 %v642_v12 }
 0x193   : > { %v629_v16 = vsel %vm617_vm4, %v601_v10, 0.0  ;;  %1103 = vmatmul.mubr.msk.f32.vlgmr.msra.gmra.mrb[6].mxu0 %vm612_vm3, %v599_v55 }
 0x194   : > { %v636_v17 = vrot.slane %v629_v16, 2  ;;  %v643_v18 = vrot.slane %v629_v16, 4  ;;  %1479 = vmatpush3.bf16.msra.mxu0 %v1476_v32  ;;  %v867_v32 = vld [vmem:[#allocation8 + $0x68] sm:$0xff] }
 0x195   : > { %1481 = vmatprep.subr.bf16.mxu0 %v1480_v13  ;;  %v1500_v33 = vpack.c.bf16 %v867_v32, %v866_v31 }
 0x196   : > { %v637_v20 = vsel %vm366_vm1, %v634_v7, %v636_v17  ;;  %v644_v21 = vsel %vm375_vm2, %v641_v8, %v643_v18 }
 0x197   : > { %771 = vmatprep.mubr.f32.mxu0 %v637_v20  ;;  %1319 = vmatmul.mubr.f32.vlgmr.msra.gmra.mrb[6].mxu1 %v644_v21 }
 0x198   : > { %1483 = vmatpush3.bf16.msra.mxu0 %v1480_v13 }
 0x199   : > { %772 = vmatmul.mubr.f32.gmra.mrb[8].mxu0 %v600_v2  ;;  %1485 = vmatprep.subr.bf16.mxu0 %v1484_v19 }
 0x19a   : > { %1353 = vmatprep.mubr.f32.mxu0 %v2137_v38 }
 0x19c   : > { %1487 = vmatpush3.bf16.msra.mxu0 %v1484_v19 }
 0x19d   : > { %1489 = vmatprep.subr.bf16.mxu0 %v1488_v24 }
 0x1a0   : > { %1491 = vmatpush3.bf16.msra.mxu0 %v1488_v24 }
 0x1a1   : > { %1493 = vmatprep.subr.bf16.mxu0 %v1492_v27 }
 0x1a4   : > { %1495 = vmatpush3.bf16.msra.mxu0 %v1492_v27 }
 0x1a5   : > { %1497 = vmatprep.subr.bf16.mxu0 %v1496_v30 }
 0x1a8   : > { %1499 = vmatpush3.bf16.msra.mxu0 %v1496_v30 }
 0x1a9   : > { %1501 = vmatprep.subr.bf16.mxu0 %v1500_v33 }
 0x1ac   : > { %1503 = vmatpush3.bf16.msra.mxu0 %v1500_v33 }
 0x1ad   : > { %1505 = vmatprep.subr.bf16.mxu0 %v1504_v36 }
 0x1b0   : > { %1507 = vmatpush3.bf16.msra.mxu0 %v1504_v36 }
 0x1b3   : > { %1354 = vmatmul.mubr.f32.vlgmr.msra.gmra.mrb[10].mxu0 %v2145_v50  ;;  %v1104_v50 = vld [vmem:[%s2259_s6] ss:$0 sm:$0xff] }
 0x266   : > { %v1203_v38 = vpop.f32.mrb[6].mxu0 }
 0x267   : > { %v1204_v37 = vpop.f32.mrb[7].mxu0 }
 0x268   : > { %v1205_v39 = vadd.f32 %v1204_v37, %v1203_v38 }
 0x26a   : > { %v1320_v40 = vpop.f32.mrb[6].mxu1  ;;  %v769_v41 = vadd.f32 %v1205_v39, %v1102_v0 }
 0x26b   : > { %v843_v42 = vpop.f32.mrb[7].mxu1 }
 0x26c   : > { %v1206_v43 = vpop.f32.mrb[8].mxu0  ;;  %v844_v44 = vadd.f32 %v843_v42, %v769_v41 }
 0x26d   : > { %v1207_v45 = vpop.f32.mrb[9].mxu0 }
 0x26e   : > { %v1208_v46 = vadd.f32 %v1207_v45, %v1206_v43  ;;  %v852_v55 = vmax.f32 %v844_v44, 0.0 }
 0x270   : > { %v774_v49 = vadd.f32 %v1208_v46, %v1102_v0 }
 0x272   : > { %v849_v47 = vadd.f32 %v1320_v40, %v774_v49 }
 0x274   : > { %v853_v52 = vmax.f32 %v849_v47, 0.0 }
 0x286   : > { %v1355_v51 = vpop.f32.mrb[10].mxu0 }
 0x287   : > { %v949_v53 = vadd.f32 %v1355_v51, %v1104_v50  ;;  %v943_v54 = vpop.f32.mrb[11].mxu0 }
 0x288   : > { %v944_v56 = vadd.f32 %v1104_v50, %v943_v54 }
 0x289   : > { %v953_v48 = vadd.f32 %v949_v53, %v853_v52 }
 0x28a   : > { %v952_v57 = vadd.f32 %v944_v56, %v852_v55 }
 0x28b   : > { %955 = vst [vmem:[%s358_s24 + $0x8] sm:$0xff] %v953_v48 }
 0x28c   : > { %954 = vst [vmem:[%s358_s24] sm:$0xff] %v952_v57 }
 0x28d   : > { %1738 = shalt.err (!%p1735_p0)
}
 0x28e   : > { %s1739_s23 = scalar_lea.hbm %s2176_s17, 256  ;;  %s1743_s18 = scalar_lea.hbm %s2260_s30, 512 }
 0x28f   : > { %p1740_p4 = scmp.ne.s32.totalorder %s2176_s17, %s1739_s23  ;;  %p1744_p12 = scmp.lt.u32.totalorder %s2176_s17, %s2260_s30 }
 0x290   : > { %p1745_p1 = scmp.lt.u32.totalorder %s1743_s18, %s1739_s23  ;;  %p1747_p13 = scmp.lt.u32.totalorder %s1739_s23, %s2176_s17 }
 0x291   : > { %p1741_p2 = pnand %p1740_p4, %p2029_p10 }
 0x292   : > { %p1746_p11 = por %p1745_p1, %p1744_p12 }
 0x293   : > { %p1742_p8 = pneg %p1741_p2 }
 0x294   : > { %p1748_p6 = por %p1747_p13, %p1746_p11 }
 0x296   : > { %p1749_p3 = pnand %p1748_p6, %p1742_p8 }
 0x298   : > { %1752 = shalt.err (!%p1749_p3)
}
 0x299   : > { %s1827_s15 = smov 128   ;;  %s1828_s22 = smov 8  }
 0x29a   : > { %1525 = dma.vmem_to_hbm [thread:$0]  (%p2029_p10), %s2171_s20, 256, %s2176_s17, %s957_s27, %s1827_s15, %s1827_s15, %s1828_s22  }
 0x29b PF: > { %s2261_s12 = sld [smem:[#allocation15_spill]]  ;;  %s2262_s19 = sld [smem:[#allocation16_spill]] }
 0x29c   : > { %p2264_p7 = scmp.ge.s32.totalorder %s1815_s29, 2 }
 0x2a1   : > { %s987_s9 = sand.u32 1, %s2261_s12   ;;  %p2263_p5 = scmp.ne.s32.totalorder %s2262_s19, 0 }
 0x2a2   : > { %s988_s11 = scalar_lea.sflag [#allocation4], %s987_s9 }
 0x2a3   : > { %p1542_p9 = pnand %p2264_p7, %p2263_p5 }
 0x2a5   : > { %1790 = dma.done.wait (!%p1542_p9), %s988_s11, 256  }
 0x2a6   : > { %1792 = vsyncadd (!%p1542_p9), %s988_s11, 4294967040  ;;  %s25_s29 = sadd.s32 1, %s1815_s29   ;;  %s2265_s24 = smov %s1799_s25 }
 0x2a7   : > { %p22_p0 = scmp.ge.s32.totalorder %s25_s29, 4   ;;  %s2266_s25 = smov %s1803_s26 }
 0x2a8   : > { %s2267_s26 = smov %s2045_s10  ;;  %s2268_s27 = smov %s1811_s28 }
 0x2a9   : > { %s2269_s28 = smov %s2271_s16  ;;  %24 = sbr.rel (!%p22_p0) target bundleno = 11 (0xb), region = 105 }
 0x2b0   :  { %993 = vsyncpa [#allocation3], 1 }
 0x2b1   :  { %995 = vsyncpa [#allocation3 + $0x1], 1 }
 0x2b2   :  { %996 = vsyncpa [#allocation6], 1 }
 0x2b3   :  { %997 = vsyncpa [#allocation9], 1 }
 0x2b4   :  { %998 = vsyncpa [#allocation4], 1 }
 0x2b5   :  { %1000 = vsyncpa [#allocation4 + $0x1], 1 }

</bundles_post_ra>
